<compile_context>
chip_gen: v7x
topology: tpu7x:2x2x1
jax: 0.10.0
libtpu: 0.0.40
codegen_flags: <defaults>
</compile_context>

<pallas_src>
import math
import numpy as np
import jax
import jax.numpy as jnp
from jax.experimental import pallas as pl
from jax.experimental.pallas import tpu as pltpu

# ----------------------------- model hyper-parameters -----------------------------
NUM_LAYERS = 2
NUM_HEADS = 4
HEAD_DIM = 8
EMBED_DIM = NUM_HEADS * HEAD_DIM          # 32
HIDDEN_DIM = 64
B, C, IMG_H, IMG_W = 2, 4, 16, 16
CHW = C * IMG_H * IMG_W                   # 1024
RMS_EPS = 1e-6


# ----------------------------------- kernel ---------------------------------------
def encoder_kernel(x_ref, fw_ref, fb_ref,
                   attn_nw_ref, wvo_ref,
                   mlp_nw_ref, w13_ref, w2_ref,
                   final_nw_ref, out_ref):
    # Feature extractor: full-image Conv2d == one matmul over the flattened image.
    # x / fw are bf16 (MXU-native); accumulate in f32.
    h = jnp.dot(x_ref[...], fw_ref[...],
                preferred_element_type=jnp.float32) + fb_ref[...]        # [MP, D] f32

    def rmsnorm(v, w):
        ms = jnp.mean(v * v, axis=-1, keepdims=True)
        return v * jax.lax.rsqrt(ms + RMS_EPS) * w

    for l in range(NUM_LAYERS):
        # -------- attention block --------
        # seq_len == 1, mask == None, input_pos == None:
        #   RoPE at position 0 is identity and softmax over the single key is 1, so
        #   attn_out = (rmsnorm(h) @ vw) @ ow == rmsnorm(h) @ (vw @ ow) == hn @ W_vo
        hn = rmsnorm(h, attn_nw_ref[l])
        h = h + jnp.dot(hn, wvo_ref[l], preferred_element_type=jnp.float32)

        # -------- SwiGLU MLP block (w1 | w3 fused into one lane-dense matmul) --------
        hn2 = rmsnorm(h, mlp_nw_ref[l])
        y = jnp.dot(hn2, w13_ref[l], preferred_element_type=jnp.float32)  # [MP, 2*HID]
        g = y[:, :HIDDEN_DIM]
        u = y[:, HIDDEN_DIM:]
        act = g * (1.0 / (1.0 + jnp.exp(-g))) * u                         # silu(g) * u
        h = h + jnp.dot(act, w2_ref[l], preferred_element_type=jnp.float32)

    # final norm; h is already float32 (matches `.float()` in the PyTorch forward)
    out_ref[...] = rmsnorm(h, final_nw_ref[...])


# --------------------------------- parameters --------------------------------------
def init_params(key):
    ks = jax.random.split(key, 8)
    scale = 0.02

    def w(k, shape):
        return scale * jax.random.normal(k, shape, dtype=jnp.float32)

    return {
        "fw": w(ks[0], (CHW, EMBED_DIM)),
        "fb": jnp.zeros((1, EMBED_DIM), jnp.float32),
        "attn_nw": jnp.ones((NUM_LAYERS, 1, EMBED_DIM), jnp.float32),
        "qw": w(ks[1], (NUM_LAYERS, EMBED_DIM, EMBED_DIM)),
        "kw": w(ks[2], (NUM_LAYERS, EMBED_DIM, EMBED_DIM)),
        "vw": w(ks[3], (NUM_LAYERS, EMBED_DIM, EMBED_DIM)),
        "ow": w(ks[4], (NUM_LAYERS, EMBED_DIM, EMBED_DIM)),
        "mlp_nw": jnp.ones((NUM_LAYERS, 1, EMBED_DIM), jnp.float32),
        "w1": w(ks[5], (NUM_LAYERS, EMBED_DIM, HIDDEN_DIM)),
        "w3": w(ks[6], (NUM_LAYERS, EMBED_DIM, HIDDEN_DIM)),
        "w2": w(ks[7], (NUM_LAYERS, HIDDEN_DIM, EMBED_DIM)),
        "final_nw": jnp.ones((1, EMBED_DIM), jnp.float32),
    }


def prepare_kernel_params(params):
    """One-time offline folding of per-layer weights into lane-dense matmuls."""
    # attention with one key: weight == 1  ->  attn block is hn @ (vw @ ow)
    w_vo = jnp.einsum("lde,lef->ldf", params["vw"], params["ow"])     # [L, D, D]
    # SwiGLU: fuse w1 | w3 into one [D, 2*HID] weight (128-lane output)
    w13 = jnp.concatenate([params["w1"], params["w3"]], axis=-1)      # [L, D, 2*HID]
    return {
        "fw_bf16": params["fw"].astype(jnp.bfloat16),   # halves the dominant DMA
        "fb": params["fb"],
        "attn_nw": params["attn_nw"],
        "w_vo": w_vo,
        "mlp_nw": params["mlp_nw"],
        "w13": w13,
        "w2": params["w2"],
        "final_nw": params["final_nw"],
    }


# --------------------------------- wrapper -----------------------------------------
def transformer_encoder(image, kparams):
    """image: [b, c, h, w] float32 (NCHW). Returns [b, 1, d] float32."""
    bsz = image.shape[0]
    mp = pl.cdiv(bsz, 8) * 8                               # pad batch to a full sublane group
    x2d = image.reshape(bsz, -1).astype(jnp.float32)       # flatten (glue)
    x_pad = jnp.pad(x2d, ((0, mp - bsz), (0, 0))).astype(jnp.bfloat16)

    inputs = (
        x_pad, kparams["fw_bf16"], kparams["fb"],
        kparams["attn_nw"], kparams["w_vo"],
        kparams["mlp_nw"], kparams["w13"], kparams["w2"],
        kparams["final_nw"],
    )

    flops = 2 * mp * CHW * EMBED_DIM + NUM_LAYERS * (
        2 * mp * EMBED_DIM * EMBED_DIM
        + 2 * mp * EMBED_DIM * (2 * HIDDEN_DIM)
        + 2 * mp * HIDDEN_DIM * EMBED_DIM)
    transcendentals = NUM_LAYERS * mp * HIDDEN_DIM + (2 * NUM_LAYERS + 1) * mp
    bytes_accessed = sum(int(a.size) * a.dtype.itemsize for a in inputs) \
        + mp * EMBED_DIM * 4

    out = pl.pallas_call(
        encoder_kernel,
        out_shape=jax.ShapeDtypeStruct((mp, EMBED_DIM), jnp.float32),
        in_specs=[pl.BlockSpec(memory_space=pltpu.MemorySpace.VMEM)] * len(inputs),
        out_specs=pl.BlockSpec(memory_space=pltpu.MemorySpace.VMEM),
        cost_estimate=pl.CostEstimate(flops=flops,
                                      transcendentals=transcendentals,
                                      bytes_accessed=bytes_accessed),
    )(*inputs)

    return out[:bsz].reshape(bsz, 1, EMBED_DIM)            # [b, 1, d]


# ------------------------------- pure-JAX reference --------------------------------
def reference_forward(image, params):
    """PyTorch-faithful reference (full q/k/v, softmax over one key, RoPE at pos 0)."""
    bsz = image.shape[0]
    x2d = image.reshape(bsz, -1).astype(jnp.float32)
    h = x2d @ params["fw"] + params["fb"]

    def rmsnorm(v, w):
        ms = jnp.mean(v * v, axis=-1, keepdims=True)
        return v * jax.lax.rsqrt(ms + RMS_EPS) * w

    for l in range(NUM_LAYERS):
        hn = rmsnorm(h, params["attn_nw"][l])
        q = (hn @ params["qw"][l]).reshape(bsz, NUM_HEADS, HEAD_DIM)
        k = (hn @ params["kw"][l]).reshape(bsz, NUM_HEADS, HEAD_DIM)
        v = (hn @ params["vw"][l]).reshape(bsz, NUM_HEADS, HEAD_DIM)
        # RoPE at position 0 is the identity.
        s = jnp.sum(q * k, axis=-1, keepdims=True) / math.sqrt(HEAD_DIM)   # [b, nh, 1]
        p = jax.nn.softmax(s[..., None], axis=-1)[..., 0]                  # == 1
        attn = (p * v).reshape(bsz, EMBED_DIM)
        h = h + attn @ params["ow"][l]

        hn2 = rmsnorm(h, params["mlp_nw"][l])
        g = hn2 @ params["w1"][l]
        u = hn2 @ params["w3"][l]
        h = h + (jax.nn.silu(g) * u) @ params["w2"][l]

    return rmsnorm(h, params["final_nw"]).reshape(bsz, 1, EMBED_DIM).astype(jnp.float32)


# ------------------------------------- main -----------------------------------------
if __name__ == "__main__":
    key = jax.random.PRNGKey(0)
    k_img, k_par = jax.random.split(key)
    image = jax.random.normal(k_img, (B, C, IMG_H, IMG_W), dtype=jnp.float32)
    params = init_params(k_par)
    kparams = prepare_kernel_params(params)

    out = jax.block_until_ready(transformer_encoder(image, kparams))
    assert out.shape == (B, 1, EMBED_DIM) and out.dtype == jnp.float32

    ref = jax.block_until_ready(reference_forward(image, params))
    np.testing.assert_allclose(np.asarray(out), np.asarray(ref), rtol=2e-2, atol=2e-2)

    print("KERNEL_OK")
</pallas_src>

<mosaic_0001>
module attributes {stable_mosaic.version = 11 : i64} {
  func.func @encoder_kernel(%arg0: memref<8x1024xbf16, #tpu.memory_space<vmem>>, %arg1: memref<1024x32xbf16, #tpu.memory_space<vmem>>, %arg2: memref<1x32xf32, #tpu.memory_space<vmem>>, %arg3: memref<2x1x32xf32, #tpu.memory_space<vmem>>, %arg4: memref<2x32x32xf32, #tpu.memory_space<vmem>>, %arg5: memref<2x1x32xf32, #tpu.memory_space<vmem>>, %arg6: memref<2x32x128xf32, #tpu.memory_space<vmem>>, %arg7: memref<2x64x32xf32, #tpu.memory_space<vmem>>, %arg8: memref<1x32xf32, #tpu.memory_space<vmem>>, %arg9: memref<8x32xf32, #tpu.memory_space<vmem>>) attributes {dimension_semantics = [], scalar_prefetch = 0 : i64, scratch_operands = 0 : i64, tpu.core_type = #tpu.core_type<tc>} {
    %c0 = arith.constant 0 : index
    %c0_0 = arith.constant 0 : index
    %0 = vector.load %arg0[%c0, %c0_0] : memref<8x1024xbf16, #tpu.memory_space<vmem>>, vector<8x1024xbf16>
    %c0_1 = arith.constant 0 : index
    %c0_2 = arith.constant 0 : index
    %1 = vector.load %arg1[%c0_1, %c0_2] : memref<1024x32xbf16, #tpu.memory_space<vmem>>, vector<1024x32xbf16>
    %cst = arith.constant dense<0.000000e+00> : vector<8x32xf32>
    %2 = tpu.matmul %0, %1, %cst {dimension_numbers = #tpu.dot_dimension_numbers<[1], [0], [0], [1], [0, 0, 1, 1], [], []>} : vector<8x1024xbf16>, vector<1024x32xbf16>, vector<8x32xf32> -> vector<8x32xf32>
    %c0_3 = arith.constant 0 : index
    %c0_4 = arith.constant 0 : index
    %3 = vector.load %arg2[%c0_3, %c0_4] : memref<1x32xf32, #tpu.memory_space<vmem>>, vector<1x32xf32>
    %4 = vector.broadcast %3 : vector<1x32xf32> to vector<8x32xf32>
    %5 = arith.addf %2, %4 : vector<8x32xf32>
    %c0_5 = arith.constant 0 : index
    %c0_6 = arith.constant 0 : index
    %c0_7 = arith.constant 0 : index
    %6 = vector.load %arg3[%c0_5, %c0_6, %c0_7] : memref<2x1x32xf32, #tpu.memory_space<vmem>>, vector<1x1x32xf32>
    %7 = vector.shape_cast %6 : vector<1x1x32xf32> to vector<1x32xf32>
    %8 = arith.mulf %5, %5 : vector<8x32xf32>
    %cst_8 = arith.constant dense<0.000000e+00> : vector<8xf32>
    %9 = vector.multi_reduction <add>, %8, %cst_8 [1] : vector<8x32xf32> to vector<8xf32>
    %10 = vector.shape_cast %9 : vector<8xf32> to vector<8x1xf32>
    %cst_9 = arith.constant 3.200000e+01 : f32
    %11 = vector.broadcast %cst_9 : f32 to vector<8x1xf32>
    %12 = arith.divf %10, %11 : vector<8x1xf32>
    %cst_10 = arith.constant 9.99999997E-7 : f32
    %13 = vector.broadcast %cst_10 : f32 to vector<8x1xf32>
    %14 = arith.addf %12, %13 : vector<8x1xf32>
    %15 = math.rsqrt %14 : vector<8x1xf32>
    %16 = vector.broadcast %15 : vector<8x1xf32> to vector<8x32xf32>
    %17 = arith.mulf %5, %16 : vector<8x32xf32>
    %18 = vector.broadcast %7 : vector<1x32xf32> to vector<8x32xf32>
    %19 = arith.mulf %17, %18 : vector<8x32xf32>
    %c0_11 = arith.constant 0 : index
    %c0_12 = arith.constant 0 : index
    %c0_13 = arith.constant 0 : index
    %20 = vector.load %arg4[%c0_11, %c0_12, %c0_13] : memref<2x32x32xf32, #tpu.memory_space<vmem>>, vector<1x32x32xf32>
    %21 = vector.shape_cast %20 : vector<1x32x32xf32> to vector<32x32xf32>
    %cst_14 = arith.constant dense<0.000000e+00> : vector<8x32xf32>
    %22 = tpu.matmul %19, %21, %cst_14 {dimension_numbers = #tpu.dot_dimension_numbers<[1], [0], [0], [1], [0, 0, 1, 1], [], []>} : vector<8x32xf32>, vector<32x32xf32>, vector<8x32xf32> -> vector<8x32xf32>
    %23 = arith.addf %5, %22 : vector<8x32xf32>
    %c0_15 = arith.constant 0 : index
    %c0_16 = arith.constant 0 : index
    %c0_17 = arith.constant 0 : index
    %24 = vector.load %arg5[%c0_15, %c0_16, %c0_17] : memref<2x1x32xf32, #tpu.memory_space<vmem>>, vector<1x1x32xf32>
    %25 = vector.shape_cast %24 : vector<1x1x32xf32> to vector<1x32xf32>
    %26 = arith.mulf %23, %23 : vector<8x32xf32>
    %cst_18 = arith.constant dense<0.000000e+00> : vector<8xf32>
    %27 = vector.multi_reduction <add>, %26, %cst_18 [1] : vector<8x32xf32> to vector<8xf32>
    %28 = vector.shape_cast %27 : vector<8xf32> to vector<8x1xf32>
    %cst_19 = arith.constant 3.200000e+01 : f32
    %29 = vector.broadcast %cst_19 : f32 to vector<8x1xf32>
    %30 = arith.divf %28, %29 : vector<8x1xf32>
    %cst_20 = arith.constant 9.99999997E-7 : f32
    %31 = vector.broadcast %cst_20 : f32 to vector<8x1xf32>
    %32 = arith.addf %30, %31 : vector<8x1xf32>
    %33 = math.rsqrt %32 : vector<8x1xf32>
    %34 = vector.broadcast %33 : vector<8x1xf32> to vector<8x32xf32>
    %35 = arith.mulf %23, %34 : vector<8x32xf32>
    %36 = vector.broadcast %25 : vector<1x32xf32> to vector<8x32xf32>
    %37 = arith.mulf %35, %36 : vector<8x32xf32>
    %c0_21 = arith.constant 0 : index
    %c0_22 = arith.constant 0 : index
    %c0_23 = arith.constant 0 : index
    %38 = vector.load %arg6[%c0_21, %c0_22, %c0_23] : memref<2x32x128xf32, #tpu.memory_space<vmem>>, vector<1x32x128xf32>
    %39 = vector.shape_cast %38 : vector<1x32x128xf32> to vector<32x128xf32>
    %cst_24 = arith.constant dense<0.000000e+00> : vector<8x128xf32>
    %40 = tpu.matmul %37, %39, %cst_24 {dimension_numbers = #tpu.dot_dimension_numbers<[1], [0], [0], [1], [0, 0, 1, 1], [], []>} : vector<8x32xf32>, vector<32x128xf32>, vector<8x128xf32> -> vector<8x128xf32>
    %41 = vector.extract_strided_slice %40 {offsets = [0, 0], sizes = [8, 64], strides = [1, 1]} : vector<8x128xf32> to vector<8x64xf32>
    %42 = vector.extract_strided_slice %40 {offsets = [0, 64], sizes = [8, 64], strides = [1, 1]} : vector<8x128xf32> to vector<8x64xf32>
    %cst_25 = arith.constant 0.000000e+00 : f32
    %43 = vector.broadcast %cst_25 : f32 to vector<8x64xf32>
    %44 = arith.subf %43, %41 : vector<8x64xf32>
    %45 = math.exp %44 : vector<8x64xf32>
    %cst_26 = arith.constant 1.000000e+00 : f32
    %46 = vector.broadcast %cst_26 : f32 to vector<8x64xf32>
    %47 = arith.addf %46, %45 : vector<8x64xf32>
    %cst_27 = arith.constant 1.000000e+00 : f32
    %48 = vector.broadcast %cst_27 : f32 to vector<8x64xf32>
    %49 = arith.divf %48, %47 : vector<8x64xf32>
    %50 = arith.mulf %41, %49 : vector<8x64xf32>
    %51 = arith.mulf %50, %42 : vector<8x64xf32>
    %c0_28 = arith.constant 0 : index
    %c0_29 = arith.constant 0 : index
    %c0_30 = arith.constant 0 : index
    %52 = vector.load %arg7[%c0_28, %c0_29, %c0_30] : memref<2x64x32xf32, #tpu.memory_space<vmem>>, vector<1x64x32xf32>
    %53 = vector.shape_cast %52 : vector<1x64x32xf32> to vector<64x32xf32>
    %cst_31 = arith.constant dense<0.000000e+00> : vector<8x32xf32>
    %54 = tpu.matmul %51, %53, %cst_31 {dimension_numbers = #tpu.dot_dimension_numbers<[1], [0], [0], [1], [0, 0, 1, 1], [], []>} : vector<8x64xf32>, vector<64x32xf32>, vector<8x32xf32> -> vector<8x32xf32>
    %55 = arith.addf %23, %54 : vector<8x32xf32>
    %c1 = arith.constant 1 : index
    %c0_32 = arith.constant 0 : index
    %c0_33 = arith.constant 0 : index
    %56 = vector.load %arg3[%c1, %c0_32, %c0_33] : memref<2x1x32xf32, #tpu.memory_space<vmem>>, vector<1x1x32xf32>
    %57 = vector.shape_cast %56 : vector<1x1x32xf32> to vector<1x32xf32>
    %58 = arith.mulf %55, %55 : vector<8x32xf32>
    %cst_34 = arith.constant dense<0.000000e+00> : vector<8xf32>
    %59 = vector.multi_reduction <add>, %58, %cst_34 [1] : vector<8x32xf32> to vector<8xf32>
    %60 = vector.shape_cast %59 : vector<8xf32> to vector<8x1xf32>
    %cst_35 = arith.constant 3.200000e+01 : f32
    %61 = vector.broadcast %cst_35 : f32 to vector<8x1xf32>
    %62 = arith.divf %60, %61 : vector<8x1xf32>
    %cst_36 = arith.constant 9.99999997E-7 : f32
    %63 = vector.broadcast %cst_36 : f32 to vector<8x1xf32>
    %64 = arith.addf %62, %63 : vector<8x1xf32>
    %65 = math.rsqrt %64 : vector<8x1xf32>
    %66 = vector.broadcast %65 : vector<8x1xf32> to vector<8x32xf32>
    %67 = arith.mulf %55, %66 : vector<8x32xf32>
    %68 = vector.broadcast %57 : vector<1x32xf32> to vector<8x32xf32>
    %69 = arith.mulf %67, %68 : vector<8x32xf32>
    %c1_37 = arith.constant 1 : index
    %c0_38 = arith.constant 0 : index
    %c0_39 = arith.constant 0 : index
    %70 = vector.load %arg4[%c1_37, %c0_38, %c0_39] : memref<2x32x32xf32, #tpu.memory_space<vmem>>, vector<1x32x32xf32>
    %71 = vector.shape_cast %70 : vector<1x32x32xf32> to vector<32x32xf32>
    %cst_40 = arith.constant dense<0.000000e+00> : vector<8x32xf32>
    %72 = tpu.matmul %69, %71, %cst_40 {dimension_numbers = #tpu.dot_dimension_numbers<[1], [0], [0], [1], [0, 0, 1, 1], [], []>} : vector<8x32xf32>, vector<32x32xf32>, vector<8x32xf32> -> vector<8x32xf32>
    %73 = arith.addf %55, %72 : vector<8x32xf32>
    %c1_41 = arith.constant 1 : index
    %c0_42 = arith.constant 0 : index
    %c0_43 = arith.constant 0 : index
    %74 = vector.load %arg5[%c1_41, %c0_42, %c0_43] : memref<2x1x32xf32, #tpu.memory_space<vmem>>, vector<1x1x32xf32>
    %75 = vector.shape_cast %74 : vector<1x1x32xf32> to vector<1x32xf32>
    %76 = arith.mulf %73, %73 : vector<8x32xf32>
    %cst_44 = arith.constant dense<0.000000e+00> : vector<8xf32>
    %77 = vector.multi_reduction <add>, %76, %cst_44 [1] : vector<8x32xf32> to vector<8xf32>
    %78 = vector.shape_cast %77 : vector<8xf32> to vector<8x1xf32>
    %cst_45 = arith.constant 3.200000e+01 : f32
    %79 = vector.broadcast %cst_45 : f32 to vector<8x1xf32>
    %80 = arith.divf %78, %79 : vector<8x1xf32>
    %cst_46 = arith.constant 9.99999997E-7 : f32
    %81 = vector.broadcast %cst_46 : f32 to vector<8x1xf32>
    %82 = arith.addf %80, %81 : vector<8x1xf32>
    %83 = math.rsqrt %82 : vector<8x1xf32>
    %84 = vector.broadcast %83 : vector<8x1xf32> to vector<8x32xf32>
    %85 = arith.mulf %73, %84 : vector<8x32xf32>
    %86 = vector.broadcast %75 : vector<1x32xf32> to vector<8x32xf32>
    %87 = arith.mulf %85, %86 : vector<8x32xf32>
    %c1_47 = arith.constant 1 : index
    %c0_48 = arith.constant 0 : index
    %c0_49 = arith.constant 0 : index
    %88 = vector.load %arg6[%c1_47, %c0_48, %c0_49] : memref<2x32x128xf32, #tpu.memory_space<vmem>>, vector<1x32x128xf32>
    %89 = vector.shape_cast %88 : vector<1x32x128xf32> to vector<32x128xf32>
    %cst_50 = arith.constant dense<0.000000e+00> : vector<8x128xf32>
    %90 = tpu.matmul %87, %89, %cst_50 {dimension_numbers = #tpu.dot_dimension_numbers<[1], [0], [0], [1], [0, 0, 1, 1], [], []>} : vector<8x32xf32>, vector<32x128xf32>, vector<8x128xf32> -> vector<8x128xf32>
    %91 = vector.extract_strided_slice %90 {offsets = [0, 0], sizes = [8, 64], strides = [1, 1]} : vector<8x128xf32> to vector<8x64xf32>
    %92 = vector.extract_strided_slice %90 {offsets = [0, 64], sizes = [8, 64], strides = [1, 1]} : vector<8x128xf32> to vector<8x64xf32>
    %cst_51 = arith.constant 0.000000e+00 : f32
    %93 = vector.broadcast %cst_51 : f32 to vector<8x64xf32>
    %94 = arith.subf %93, %91 : vector<8x64xf32>
    %95 = math.exp %94 : vector<8x64xf32>
    %cst_52 = arith.constant 1.000000e+00 : f32
    %96 = vector.broadcast %cst_52 : f32 to vector<8x64xf32>
    %97 = arith.addf %96, %95 : vector<8x64xf32>
    %cst_53 = arith.constant 1.000000e+00 : f32
    %98 = vector.broadcast %cst_53 : f32 to vector<8x64xf32>
    %99 = arith.divf %98, %97 : vector<8x64xf32>
    %100 = arith.mulf %91, %99 : vector<8x64xf32>
    %101 = arith.mulf %100, %92 : vector<8x64xf32>
    %c1_54 = arith.constant 1 : index
    %c0_55 = arith.constant 0 : index
    %c0_56 = arith.constant 0 : index
    %102 = vector.load %arg7[%c1_54, %c0_55, %c0_56] : memref<2x64x32xf32, #tpu.memory_space<vmem>>, vector<1x64x32xf32>
    %103 = vector.shape_cast %102 : vector<1x64x32xf32> to vector<64x32xf32>
    %cst_57 = arith.constant dense<0.000000e+00> : vector<8x32xf32>
    %104 = tpu.matmul %101, %103, %cst_57 {dimension_numbers = #tpu.dot_dimension_numbers<[1], [0], [0], [1], [0, 0, 1, 1], [], []>} : vector<8x64xf32>, vector<64x32xf32>, vector<8x32xf32> -> vector<8x32xf32>
    %105 = arith.addf %73, %104 : vector<8x32xf32>
    %c0_58 = arith.constant 0 : index
    %c0_59 = arith.constant 0 : index
    %106 = vector.load %arg8[%c0_58, %c0_59] : memref<1x32xf32, #tpu.memory_space<vmem>>, vector<1x32xf32>
    %107 = arith.mulf %105, %105 : vector<8x32xf32>
    %cst_60 = arith.constant dense<0.000000e+00> : vector<8xf32>
    %108 = vector.multi_reduction <add>, %107, %cst_60 [1] : vector<8x32xf32> to vector<8xf32>
    %109 = vector.shape_cast %108 : vector<8xf32> to vector<8x1xf32>
    %cst_61 = arith.constant 3.200000e+01 : f32
    %110 = vector.broadcast %cst_61 : f32 to vector<8x1xf32>
    %111 = arith.divf %109, %110 : vector<8x1xf32>
    %cst_62 = arith.constant 9.99999997E-7 : f32
    %112 = vector.broadcast %cst_62 : f32 to vector<8x1xf32>
    %113 = arith.addf %111, %112 : vector<8x1xf32>
    %114 = math.rsqrt %113 : vector<8x1xf32>
    %115 = vector.broadcast %114 : vector<8x1xf32> to vector<8x32xf32>
    %116 = arith.mulf %105, %115 : vector<8x32xf32>
    %117 = vector.broadcast %106 : vector<1x32xf32> to vector<8x32xf32>
    %118 = arith.mulf %116, %117 : vector<8x32xf32>
    %c0_63 = arith.constant 0 : index
    %c0_64 = arith.constant 0 : index
    %119 = vector.load %arg9[%c0_63, %c0_64] : memref<8x32xf32, #tpu.memory_space<vmem>>, vector<8x32xf32>
    tpu.vector_store %arg9[%c0_63, %c0_64], %118 {strides = array<i32>} : memref<8x32xf32, #tpu.memory_space<vmem>>, vector<8x32xf32>,
    return
  }
}

</mosaic_0001>

<bundles_post_ra>
// kernel: tpu_custom_call.1
= control target key start
LH: loop header
LB: loop body
LE: loop exit
PB: predicated region body
PF: predicated region fallthrough
CT: control target
= control target key end

     0   :  { %s2256_s0 = inlined_call_operand.vmem [shape: bf16[8,1024], index: 0, kind: input, shape index: {}]   ;;  %s2257_s1 = inlined_call_operand.vmem [shape: bf16[1024,32], index: 1, kind: input, shape index: {}]   ;;  %s2258_s2 = inlined_call_operand.vmem [shape: f32[1,32], index: 2, kind: input, shape index: {}]   ;;  %s2259_s3 = inlined_call_operand.vmem [shape: f32[2,1,32], index: 3, kind: input, shape index: {}]   ;;  %s2260_s4 = inlined_call_operand.vmem [shape: f32[2,32,32], index: 4, kind: input, shape index: {}]   ;;  %s2261_s5 = inlined_call_operand.vmem [shape: f32[2,1,32], index: 5, kind: input, shape index: {}]   ;;  %s2262_s6 = inlined_call_operand.vmem [shape: f32[2,32,128], index: 6, kind: input, shape index: {}]   ;;  %s2263_s7 = inlined_call_operand.vmem [shape: f32[2,64,32], index: 7, kind: input, shape index: {}]   ;;  %s2264_s8 = inlined_call_operand.vmem [shape: f32[1,32], index: 8, kind: input, shape index: {}]   ;;  %s2265_s9 = inlined_call_operand.hbm [shape: f32[8,32], index: 9, kind: output, shape index: {}]  }
   0x1   :  { %v1709_v0 = vld [vmem:[%s2257_s1 + $0x40] sm:$0xff]   ;;  %v1713_v4 = vld [vmem:[%s2257_s1 + $0x48] sm:$0xff]   ;;  %v1717_v8 = vld [vmem:[%s2257_s1 + $0x50] sm:$0xff]  }
   0x2   :  { %v1710_v1 = vld [vmem:[%s2257_s1 + $0xc0] sm:$0xff]   ;;  %1448 = vmatprep.subr.bf16.mxu0 %v1709_v0  ;;  %v1714_v5 = vld [vmem:[%s2257_s1 + $0xc8] sm:$0xff]   ;;  %v1718_v9 = vld [vmem:[%s2257_s1 + $0xd0] sm:$0xff]  }
   0x3   :  { %v1711_v2 = vld [vmem:[%s2257_s1] sm:$0xff]   ;;  %1470 = vmatprep.subr.bf16.mxu1 %v1710_v1  ;;  %v1715_v6 = vld [vmem:[%s2257_s1 + $0x8] sm:$0xff]   ;;  %v1719_v10 = vld [vmem:[%s2257_s1 + $0x10] sm:$0xff]  }
   0x4   :  { %v1712_v3 = vld [vmem:[%s2257_s1 + $0x80] sm:$0xff]   ;;  %1449 = vmatpush3.bf16.msra.mxu0 %v1711_v2  ;;  %v1716_v7 = vld [vmem:[%s2257_s1 + $0x88] sm:$0xff]   ;;  %v1720_v11 = vld [vmem:[%s2257_s1 + $0x90] sm:$0xff]  }
   0x5   :  { %1471 = vmatpush3.bf16.msra.mxu1 %v1712_v3  ;;  %1450 = vmatprep.subr.bf16.mxu0 %v1713_v4  ;;  %v1721_v12 = vld [vmem:[%s2257_s1 + $0x58] sm:$0xff]   ;;  %v1725_v16 = vld [vmem:[%s2257_s1 + $0x60] sm:$0xff]   ;;  %v1729_v20 = vld [vmem:[%s2257_s1 + $0x68] sm:$0xff]  }
   0x6   :  { %1472 = vmatprep.subr.bf16.mxu1 %v1714_v5  ;;  %v1722_v13 = vld [vmem:[%s2257_s1 + $0xd8] sm:$0xff]   ;;  %v1726_v17 = vld [vmem:[%s2257_s1 + $0xe0] sm:$0xff]   ;;  %v1730_v21 = vld [vmem:[%s2257_s1 + $0xe8] sm:$0xff]  }
   0x7   :  { %v1723_v14 = vld [vmem:[%s2257_s1 + $0x18] sm:$0xff]   ;;  %v1727_v18 = vld [vmem:[%s2257_s1 + $0x20] sm:$0xff]   ;;  %v1731_v22 = vld [vmem:[%s2257_s1 + $0x28] sm:$0xff]  }
   0x8   :  { %1451 = vmatpush3.bf16.msra.mxu0 %v1715_v6  ;;  %v1724_v15 = vld [vmem:[%s2257_s1 + $0x98] sm:$0xff]   ;;  %v1728_v19 = vld [vmem:[%s2257_s1 + $0xa0] sm:$0xff]   ;;  %v1732_v23 = vld [vmem:[%s2257_s1 + $0xa8] sm:$0xff]  }
   0x9   :  { %1473 = vmatpush3.bf16.msra.mxu1 %v1716_v7  ;;  %1452 = vmatprep.subr.bf16.mxu0 %v1717_v8  ;;  %v1733_v24 = vld [vmem:[%s2257_s1 + $0x70] sm:$0xff]   ;;  %v1737_v28 = vld [vmem:[%s2257_s1 + $0x78] sm:$0xff]   ;;  %v34_v32 = vld [vmem:[%s2256_s0] sm:$0xff] }
   0xa   :  { %1474 = vmatprep.subr.bf16.mxu1 %v1718_v9  ;;  %v1734_v25 = vld [vmem:[%s2257_s1 + $0xf0] sm:$0xff]   ;;  %v1738_v29 = vld [vmem:[%s2257_s1 + $0xf8] sm:$0xff]   ;;  %v35_v33 = vld [vmem:[%s2256_s0 + $0x8] sm:$0xff]  ;;  %v1347_v34 = vcombine.low %v34_v32, %v34_v32  ;;  %v1348_v35 = vcombine.high %v34_v32, %v34_v32 }
   0xb   :  { %v1735_v26 = vld [vmem:[%s2257_s1 + $0x30] sm:$0xff]   ;;  %v1739_v30 = vld [vmem:[%s2257_s1 + $0x38] sm:$0xff]   ;;  %v1349_v36 = vcombine.low %v35_v33, %v35_v33  ;;  %v1350_v37 = vcombine.high %v35_v33, %v35_v33  ;;  %v1745_v38 = vld [vmem:[%s2257_s1 + $0x140] sm:$0xff]  }
   0xc   :  { %1453 = vmatpush3.bf16.msra.mxu0 %v1719_v10  ;;  %v1736_v27 = vld [vmem:[%s2257_s1 + $0xb0] sm:$0xff]   ;;  %v1740_v31 = vld [vmem:[%s2257_s1 + $0xb8] sm:$0xff]   ;;  %v1746_v39 = vld [vmem:[%s2257_s1 + $0x1c0] sm:$0xff]   ;;  %617 = vmatprep.mubr.bf16.mxu0 %v1348_v35 }
   0xd   :  { %1475 = vmatpush3.bf16.msra.mxu1 %v1720_v11  ;;  %1454 = vmatprep.subr.bf16.mxu0 %v1721_v12  ;;  %v1747_v40 = vld [vmem:[%s2257_s1 + $0x100] sm:$0xff]   ;;  %v1749_v42 = vld [vmem:[%s2257_s1 + $0x148] sm:$0xff]   ;;  %v1753_v46 = vld [vmem:[%s2257_s1 + $0x150] sm:$0xff]  }
   0xe   :  { %1476 = vmatprep.subr.bf16.mxu1 %v1722_v13  ;;  %657 = vmatprep.mubr.bf16.mxu1 %v1350_v37  ;;  %v1748_v41 = vld [vmem:[%s2257_s1 + $0x180] sm:$0xff]   ;;  %v1750_v43 = vld [vmem:[%s2257_s1 + $0x1c8] sm:$0xff]   ;;  %v1754_v47 = vld [vmem:[%s2257_s1 + $0x1d0] sm:$0xff]  }
   0xf   :  { %v1751_v44 = vld [vmem:[%s2257_s1 + $0x108] sm:$0xff]   ;;  %v1755_v48 = vld [vmem:[%s2257_s1 + $0x110] sm:$0xff]   ;;  %v1757_v50 = vld [vmem:[%s2257_s1 + $0x158] sm:$0xff]  }
  0x10   :  { %1455 = vmatpush3.bf16.msra.mxu0 %v1723_v14  ;;  %v1752_v45 = vld [vmem:[%s2257_s1 + $0x188] sm:$0xff]   ;;  %v1756_v49 = vld [vmem:[%s2257_s1 + $0x190] sm:$0xff]   ;;  %v1758_v51 = vld [vmem:[%s2257_s1 + $0x1d8] sm:$0xff]  }
  0x11   :  { %1477 = vmatpush3.bf16.msra.mxu1 %v1724_v15  ;;  %1456 = vmatprep.subr.bf16.mxu0 %v1725_v16  ;;  %v1759_v52 = vld [vmem:[%s2257_s1 + $0x118] sm:$0xff]   ;;  %v1761_v54 = vld [vmem:[%s2257_s1 + $0x160] sm:$0xff]   ;;  %v1765_v58 = vld [vmem:[%s2257_s1 + $0x168] sm:$0xff]  }
  0x12   :  { %1478 = vmatprep.subr.bf16.mxu1 %v1726_v17  ;;  %v1760_v53 = vld [vmem:[%s2257_s1 + $0x198] sm:$0xff]   ;;  %v1762_v55 = vld [vmem:[%s2257_s1 + $0x1e0] sm:$0xff]   ;;  %v1766_v59 = vld [vmem:[%s2257_s1 + $0x1e8] sm:$0xff]  }
  0x13   :  { %v1763_v56 = vld [vmem:[%s2257_s1 + $0x120] sm:$0xff]   ;;  %v1767_v60 = vld [vmem:[%s2257_s1 + $0x128] sm:$0xff]   ;;  %v1769_v62 = vld [vmem:[%s2257_s1 + $0x170] sm:$0xff]  }
  0x14   :  { %1457 = vmatpush3.bf16.msra.mxu0 %v1727_v18  ;;  %v1764_v57 = vld [vmem:[%s2257_s1 + $0x1a0] sm:$0xff]   ;;  %v1768_v61 = vld [vmem:[%s2257_s1 + $0x1a8] sm:$0xff]   ;;  %v1770_v63 = vld [vmem:[%s2257_s1 + $0x1f0] sm:$0xff]  }
  0x15   :  { %1479 = vmatpush3.bf16.msra.mxu1 %v1728_v19  ;;  %1458 = vmatprep.subr.bf16.mxu0 %v1729_v20  ;;  %v1771_v0 = vld [vmem:[%s2257_s1 + $0x130] sm:$0xff]   ;;  %v1773_v2 = vld [vmem:[%s2257_s1 + $0x178] sm:$0xff]  }
  0x16   :  { %1480 = vmatprep.subr.bf16.mxu1 %v1730_v21  ;;  %v1772_v1 = vld [vmem:[%s2257_s1 + $0x1b0] sm:$0xff]   ;;  %v1774_v3 = vld [vmem:[%s2257_s1 + $0x1f8] sm:$0xff]  }
  0x17   :  { %v1775_v4 = vld [vmem:[%s2257_s1 + $0x138] sm:$0xff]   ;;  %v36_v6 = vld [vmem:[%s2256_s0 + $0x10] sm:$0xff] }
  0x18   :  { %1459 = vmatpush3.bf16.msra.mxu0 %v1731_v22  ;;  %v1776_v5 = vld [vmem:[%s2257_s1 + $0x1b8] sm:$0xff]   ;;  %v1351_v7 = vcombine.low %v36_v6, %v36_v6  ;;  %v1352_v8 = vcombine.high %v36_v6, %v36_v6 }
  0x19   :  { %1481 = vmatpush3.bf16.msra.mxu1 %v1732_v23  ;;  %1460 = vmatprep.subr.bf16.mxu0 %v1733_v24  ;;  %v37_v9 = vld [vmem:[%s2256_s0 + $0x18] sm:$0xff] }
  0x1a   :  { %1482 = vmatprep.subr.bf16.mxu1 %v1734_v25 }
  0x1c   :  { %1461 = vmatpush3.bf16.msra.mxu0 %v1735_v26 }
  0x1d   :  { %1483 = vmatpush3.bf16.msra.mxu1 %v1736_v27  ;;  %1462 = vmatprep.subr.bf16.mxu0 %v1737_v28 }
  0x1e   :  { %1484 = vmatprep.subr.bf16.mxu1 %v1738_v29 }
  0x20   :  { %1463 = vmatpush3.bf16.msra.mxu0 %v1739_v30 }
  0x21   :  { %1485 = vmatpush3.bf16.msra.mxu1 %v1740_v31  ;;  %1492 = vmatprep.subr.bf16.mxu0 %v1745_v38 }
  0x22   :  { %1514 = vmatprep.subr.bf16.mxu1 %v1746_v39 }
  0x23   :  { %618 = vmatmul.mubr.bf16.vlgmr.msra.gmra.mrb[0].mxu0 %v1347_v34 }
  0x24   :  { %658 = vmatmul.mubr.bf16.vlgmr.msra.gmra.mrb[0].mxu1 %v1349_v36  ;;  %1493 = vmatpush3.bf16.msra.mxu0 %v1747_v40 }
  0x25   :  { %1515 = vmatpush3.bf16.msra.mxu1 %v1748_v41  ;;  %1494 = vmatprep.subr.bf16.mxu0 %v1749_v42 }
  0x26   :  { %1516 = vmatprep.subr.bf16.mxu1 %v1750_v43 }
  0x28   :  { %1495 = vmatpush3.bf16.msra.mxu0 %v1751_v44 }
  0x29   :  { %1517 = vmatpush3.bf16.msra.mxu1 %v1752_v45  ;;  %1496 = vmatprep.subr.bf16.mxu0 %v1753_v46 }
  0x2a   :  { %1518 = vmatprep.subr.bf16.mxu1 %v1754_v47 }
  0x2c   :  { %1497 = vmatpush3.bf16.msra.mxu0 %v1755_v48 }
  0x2d   :  { %1519 = vmatpush3.bf16.msra.mxu1 %v1756_v49  ;;  %1498 = vmatprep.subr.bf16.mxu0 %v1757_v50 }
  0x2e   :  { %1520 = vmatprep.subr.bf16.mxu1 %v1758_v51 }
  0x30   :  { %1499 = vmatpush3.bf16.msra.mxu0 %v1759_v52 }
  0x31   :  { %1521 = vmatpush3.bf16.msra.mxu1 %v1760_v53  ;;  %1500 = vmatprep.subr.bf16.mxu0 %v1761_v54 }
  0x32   :  { %1522 = vmatprep.subr.bf16.mxu1 %v1762_v55 }
  0x34   :  { %1501 = vmatpush3.bf16.msra.mxu0 %v1763_v56 }
  0x35   :  { %1523 = vmatpush3.bf16.msra.mxu1 %v1764_v57  ;;  %1502 = vmatprep.subr.bf16.mxu0 %v1765_v58 }
  0x36   :  { %1524 = vmatprep.subr.bf16.mxu1 %v1766_v59 }
  0x38   :  { %1503 = vmatpush3.bf16.msra.mxu0 %v1767_v60 }
  0x39   :  { %1525 = vmatpush3.bf16.msra.mxu1 %v1768_v61  ;;  %1504 = vmatprep.subr.bf16.mxu0 %v1769_v62 }
  0x3a   :  { %1526 = vmatprep.subr.bf16.mxu1 %v1770_v63 }
  0x3c   :  { %1505 = vmatpush3.bf16.msra.mxu0 %v1771_v0 }
  0x3d   :  { %1527 = vmatpush3.bf16.msra.mxu1 %v1772_v1  ;;  %1506 = vmatprep.subr.bf16.mxu0 %v1773_v2 }
  0x3e   :  { %1528 = vmatprep.subr.bf16.mxu1 %v1774_v3 }
  0x3f   :  { %14 = vsyncpa [#allocation3], 0  ;;  %v1353_v10 = vcombine.low %v37_v9, %v37_v9  ;;  %v1354_v11 = vcombine.high %v37_v9, %v37_v9  ;;  %697 = vmatprep.mubr.bf16.mxu0 %v1352_v8  ;;  %v1346_v14 = vld [vmem:[%s2258_s2] ss:$0 sm:$0xff]  ;;  %vm747_vm0 = vcmask 261120   ;;  %v764_v40 = vld [vmem:[%s2260_s4 + $0x8] sm:$0xff] }
  0x40   :  { %1507 = vmatpush3.bf16.msra.mxu0 %v1775_v4  ;;  %v763_v39 = vld [vmem:[%s2260_s4] sm:$0xff]  ;;  %v1823_v42 = vmov 0.0|0.0   ;;  %v765_v43 = vld [vmem:[%s2260_s4 + $0x10] sm:$0xff]  ;;  %v766_v44 = vld [vmem:[%s2260_s4 + $0x18] sm:$0xff]  ;;  %vm1824_vm1 = vmmov 0   ;;  %v1825_v46 = vmov 0.0  }
  0x41   :  { %1529 = vmatpush3.bf16.msra.mxu1 %v1776_v5  ;;  %737 = vmatprep.mubr.bf16.mxu1 %v1354_v11  ;;  %v1657_v41 = vpack.c.bf16 %v764_v40, %v763_v39  ;;  %v1660_v45 = vpack.c.bf16 %v766_v44, %v765_v43  ;;  %v1419_v51 = vld [vmem:[%s2259_s3] ss:$0 sm:$0xff]  ;;  %v858_v60 = vld [vmem:[%s2262_s6 + $0x8] sm:$0xff]  ;;  %v859_v62 = vld [vmem:[%s2262_s6 + $0x10] sm:$0xff]  ;;  %s1826_s30 = smov 64   ;;  %vm954_vm2 = vcmask 523264  }
  0x42   :  { %1656 = vmatprep.subr.bf16.mxu1 %v1823_v42  ;;  %1668 = vmatprep.subr.bf16.mxu0 %v1823_v42  ;;  %v857_v59 = vld [vmem:[%s2262_s6] sm:$0xff]  ;;  %v860_v63 = vld [vmem:[%s2262_s6 + $0x18] sm:$0xff]  ;;  %v947_v9 = vld [vmem:[%s2263_s7 + $0x8] sm:$0xff]  ;;  %s1827_s1 = smov [#allocation2]  }
  0x43   :  { %698 = vmatmul.mubr.bf16.vlgmr.msra.gmra.mrb[4].mxu0 %v1351_v7  ;;  %v1663_v61 = vpack.c.bf16 %v858_v60, %v857_v59  ;;  %v1666_v0 = vpack.c.bf16 %v860_v63, %v859_v62  ;;  %v1421_v5 = vld [vmem:[%s2261_s5] ss:$0 sm:$0xff]  ;;  %v1429_v39 = vld [vmem:[%s2260_s4 + $0x38] sm:$0xff] }
  0x44   :  { %738 = vmatmul.mubr.bf16.vlgmr.msra.gmra.mrb[4].mxu1 %v1353_v10  ;;  %1612 = vmatprep.mubr.msk.f32.mxu0 %vm1824_vm1, %v1825_v46  ;;  %v946_v8 = vld [vmem:[%s2263_s7] sm:$0xff]  ;;  %v948_v10 = vld [vmem:[%s2263_s7 + $0x10] sm:$0xff] }
  0x45   :  { %1658 = vmatpush3.bf16.msra.mxu1 %v1657_v41  ;;  %1582 = vmatprep.mubr.msk.f32.mxu1 %vm1824_vm1, %v1825_v46  ;;  %v1669_v11 = vpack.c.bf16 %v947_v9, %v946_v8  ;;  %v1442_v9 = vld [vmem:[%s2263_s7 + $0x60] sm:$0xff] }
  0x46   :  { %1659 = vmatprep.subr.bf16.mxu1 %v1823_v42 }
  0x47   :  { %1670 = vmatpush3.bf16.msra.mxu0 %v1669_v11 }
  0x48   :  { %1671 = vmatprep.subr.bf16.mxu0 %v1823_v42 }
  0x49   :  { %1661 = vmatpush3.bf16.msra.mxu1 %v1660_v45 }
  0x4a   :  { %1662 = vmatprep.subr.bf16.mxu1 %v1823_v42 }
  0xf6   :  { %v1464_v12 = vpop.f32.mrb[0].mxu0 }
  0xf7   :  { %v1486_v13 = vpop.f32.mrb[0].mxu1  ;;  %v1465_v15 = vpop.f32.mrb[1].mxu0 }
  0xf8   :  { %v1487_v16 = vpop.f32.mrb[1].mxu1  ;;  %v1466_v17 = vadd.f32 %v1465_v15, %v1464_v12  ;;  %v1467_v19 = vpop.f32.mrb[2].mxu0  ;;  %v949_v12 = vld [vmem:[%s2263_s7 + $0x18] sm:$0xff]  ;;  %v951_v15 = vld [vmem:[%s2263_s7 + $0x28] sm:$0xff] }
  0xf9   :  { %v1488_v18 = vadd.f32 %v1487_v16, %v1486_v13  ;;  %v1489_v20 = vpop.f32.mrb[2].mxu1  ;;  %v1468_v21 = vpop.f32.mrb[3].mxu0  ;;  %v1672_v13 = vpack.c.bf16 %v949_v12, %v948_v10  ;;  %v1443_v10 = vld [vmem:[%s2263_s7 + $0x68] sm:$0xff]  ;;  %v1444_v12 = vld [vmem:[%s2263_s7 + $0x70] sm:$0xff] }
  0xfa   :  { %v1490_v22 = vpop.f32.mrb[3].mxu1  ;;  %v620_v23 = vadd.f32 %v1466_v17, %v1346_v14  ;;  %v950_v14 = vld [vmem:[%s2263_s7 + $0x20] sm:$0xff]  ;;  %v952_v17 = vld [vmem:[%s2263_s7 + $0x30] sm:$0xff]  ;;  %v1699_v11 = vpack.c.bf16 %v1443_v10, %v1442_v9 }
  0xfb   :  { %1673 = vmatpush3.bf16.msra.mxu0 %v1672_v13  ;;  %v1675_v16 = vpack.c.bf16 %v951_v15, %v950_v14  ;;  %v1445_v13 = vld [vmem:[%s2263_s7 + $0x78] sm:$0xff] }
  0xfc   :  { %v660_v24 = vadd.f32 %v1488_v18, %v620_v23  ;;  %1674 = vmatprep.subr.bf16.mxu0 %v1823_v42  ;;  %v953_v18 = vld [vmem:[%s2263_s7 + $0x38] sm:$0xff]  ;;  %v1702_v14 = vpack.c.bf16 %v1445_v13, %v1444_v12 }
  0xfd   :  { %v1678_v19 = vpack.c.bf16 %v953_v18, %v952_v17 }
  0xff   :  { %1676 = vmatpush3.bf16.msra.mxu0 %v1675_v16 }
 0x100   :  { %1677 = vmatprep.subr.bf16.mxu0 %v1823_v42 }
 0x103   :  { %1679 = vmatpush3.bf16.msra.mxu0 %v1678_v19 }
 0x104   :  { %1692 = vmatprep.subr.bf16.mxu0 %v1823_v42 }
 0x116   :  { %v1508_v25 = vpop.f32.mrb[4].mxu0 }
 0x117   :  { %v1530_v26 = vpop.f32.mrb[4].mxu1  ;;  %v1509_v27 = vpop.f32.mrb[5].mxu0 }
 0x118   :  { %v1531_v28 = vpop.f32.mrb[5].mxu1  ;;  %v1510_v29 = vadd.f32 %v1509_v27, %v1508_v25  ;;  %v1511_v31 = vpop.f32.mrb[6].mxu0 }
 0x119   :  { %v1532_v30 = vadd.f32 %v1531_v28, %v1530_v26  ;;  %v1533_v32 = vpop.f32.mrb[6].mxu1  ;;  %v1512_v33 = vpop.f32.mrb[7].mxu0 }
 0x11a   :  { %v1534_v34 = vpop.f32.mrb[7].mxu1  ;;  %v700_v35 = vadd.f32 %v1510_v29, %v660_v24 }
 0x11c   :  { %v740_v36 = vadd.f32 %v1532_v30, %v700_v35  ;;  %v1426_v35 = vld [vmem:[%s2260_s4 + $0x20] sm:$0xff] }
 0x11e   :  { %v746_v37 = vmul.f32 %v740_v36, %v740_v36 }
 0x120   :  { %v748_v38 = vsel %vm747_vm0, %v746_v37, 0.0 }
 0x121   :  { %749 = vadd.xlane.f32.xlu0 %v748_v38  ;;  %v1428_v38 = vld [vmem:[%s2260_s4 + $0x30] sm:$0xff] }
 0x122   :  { %v1684_v40 = vpack.c.bf16 %v1429_v39, %v1428_v38 }
 0x1ae   :  { %v750_v47 = vpop.xlane.xlu0 %749 }
 0x1af   :  { %v752_v48 = vmul.f32 0.03125, %v750_v47  ;;  %v1425_v47 = vld [vmem:[%s2259_s3 + $0x1] ss:$0 sm:$0xff] }
 0x1b1   :  { %v753_v49 = vadd.f32 1e-06, %v752_v48 }
 0x1b3   :  { %1781 = vrsqrt.f32 %v753_v49 }
 0x1bd   :  { %v1782_v50 = vpop.eup %1781 }
 0x1be   :  { %v755_v52 = vmul.f32 %v1782_v50, %v740_v36 }
 0x1c0   :  { %v762_v53 = vmul.f32 %v1419_v51, %v755_v52 }
 0x1c2   :  { %1583 = vmatmul.mubr.msk.f32.vlgmr.msra.gmra.mrb[8].mxu1 %vm747_vm0, %v762_v53 }
 0x1c3   :  { %1593 = vmatprep.mubr.msk.f32.mxu1 %vm1824_vm1, %v1825_v46  ;;  %1664 = vmatpush3.bf16.msra.mxu1 %v1663_v61 }
 0x1c4   :  { %1665 = vmatprep.subr.bf16.mxu1 %v1823_v42 }
 0x1c7   :  { %1667 = vmatpush3.bf16.msra.mxu1 %v1666_v0  ;;  %v1432_v0 = vld [vmem:[%s2261_s5 + $0x1] ss:$0 sm:$0xff] }
 0x1c8   :  { %1680 = vmatprep.subr.bf16.mxu1 %v1823_v42 }
 0x295   :  { %v836_v54 = vpop.f32.mrb[8].mxu1 }
 0x296   :  { %v2112_v55 = vadd.f32 %v836_v54, %v740_v36  ;;  %v1584_v56 = vpop.f32.mrb[9].mxu1  ;;  %v1427_v36 = vld [vmem:[%s2260_s4 + $0x28] sm:$0xff]  ;;  %s1338_s4 = sshll.u32 %s1827_s1, 4  ;;  %s1339_s4 = int_to_ptr.vmem [resolvable:$true] %s1338_s4 }
 0x297   :  { %v1681_v37 = vpack.c.bf16 %v1427_v36, %v1426_v35  ;;  %v1434_v56 = vld [vmem:[%s2262_s6 + $0x28] sm:$0xff]  ;;  %s1799_s19 = scalar_lea.vmem %s1339_s4, 128  ;;  %p1804_p1 = scmp.lt.s32.totalorder %s1339_s4, %s1339_s4 }
 0x298   :  { %v842_v57 = vmul.f32 %v2112_v55, %v2112_v55  ;;  %p1800_p0 = scmp.ne.s32.totalorder %s1339_s4, %s1799_s19  ;;  %p1805_p2 = scmp.lt.s32.totalorder %s1799_s19, %s1799_s19 }
 0x29a   :  { %v843_v58 = vsel %vm747_vm0, %v842_v57, 0.0  ;;  %p1806_p3 = por %p1805_p2, %p1804_p1 }
 0x29b   :  { %844 = vadd.xlane.f32.xlu0 %v843_v58  ;;  %v1436_v58 = vld [vmem:[%s2262_s6 + $0x38] sm:$0xff] }
 0x29c   :  { %p1807_p4 = pnand %p1806_p3, %p1800_p0 }
 0x328   :  { %v845_v1 = vpop.xlane.xlu0 %844 }
 0x329   :  { %v846_v2 = vmul.f32 0.03125, %v845_v1 }
 0x32b   :  { %v847_v3 = vadd.f32 1e-06, %v846_v2 }
 0x32d   :  { %1783 = vrsqrt.f32 %v847_v3  ;;  %v1438_v3 = vld [vmem:[%s2263_s7 + $0x40] sm:$0xff] }
 0x337   :  { %v1784_v4 = vpop.eup %1783 }
 0x338   :  { %v849_v6 = vmul.f32 %v1784_v4, %v2112_v55  ;;  %v1439_v4 = vld [vmem:[%s2263_s7 + $0x48] sm:$0xff] }
 0x33a   :  { %v856_v7 = vmul.f32 %v1421_v5, %v849_v6  ;;  %v1440_v5 = vld [vmem:[%s2263_s7 + $0x50] sm:$0xff]  ;;  %v1693_v6 = vpack.c.bf16 %v1439_v4, %v1438_v3 }
 0x33c   :  { %1594 = vmatmul.mubr.msk.f32.vlgmr.msra.gmra.mrb[10].mxu1 %vm747_vm0, %v856_v7  ;;  %v1441_v7 = vld [vmem:[%s2263_s7 + $0x58] sm:$0xff] }
 0x33d   :  { %1623 = vmatprep.mubr.msk.f32.mxu1 %vm1824_vm1, %v1825_v46  ;;  %1682 = vmatpush3.bf16.msra.mxu1 %v1681_v37  ;;  %v1696_v8 = vpack.c.bf16 %v1441_v7, %v1440_v5 }
 0x33e   :  { %1683 = vmatprep.subr.bf16.mxu1 %v1823_v42 }
 0x341   :  { %1685 = vmatpush3.bf16.msra.mxu1 %v1684_v40 }
 0x342   :  { %1686 = vmatprep.subr.bf16.mxu1 %v1823_v42 }
 0x40f   :  { %v930_v20 = vpop.f32.mrb[10].mxu1 }
 0x410   :  { %942 = vrot.lane.b32.xlu1 %v930_v20, %s1826_s30  ;;  %v1595_v21 = vpop.f32.mrb[11].mxu1  ;;  %v934_v22 = vsub.f32 0.0, %v930_v20 }
 0x412   :  { %v935_v23 = vmul.f32 1.442695, %v934_v22 }
 0x414   :  { %1785 = vpow2.f32 %v935_v23 }
 0x41e   :  { %v1786_v24 = vpop.eup %1785 }
 0x41f   :  { %v937_v25 = vadd.f32 1.0, %v1786_v24 }
 0x421   :  { %1787 = vrcp.f32 %v937_v25 }
 0x42b   :  { %v1788_v26 = vpop.eup %1787 }
 0x42c   :  { %v940_v27 = vmul.f32 %v1788_v26, %v930_v20 }
 0x482   :  { %v943_v28 = vpop.permute.xlu1 %942 }
 0x483   :  { %v945_v29 = vmul.f32 %v943_v28, %v940_v27 }
 0x485   :  { %1613 = vmatmul.mubr.msk.f32.vlgmr.msra.gmra.mrb[8].mxu0 %vm954_vm2, %v945_v29 }
 0x486   :  { %1653 = vmatprep.mubr.msk.f32.mxu0 %vm1824_vm1, %v1825_v46  ;;  %1694 = vmatpush3.bf16.msra.mxu0 %v1693_v6 }
 0x487   :  { %1695 = vmatprep.subr.bf16.mxu0 %v1823_v42 }
 0x48a   :  { %1697 = vmatpush3.bf16.msra.mxu0 %v1696_v8 }
 0x48b   :  { %1698 = vmatprep.subr.bf16.mxu0 %v1823_v42 }
 0x48e   :  { %1700 = vmatpush3.bf16.msra.mxu0 %v1699_v11 }
 0x48f   :  { %1701 = vmatprep.subr.bf16.mxu0 %v1823_v42 }
 0x492   :  { %1703 = vmatpush3.bf16.msra.mxu0 %v1702_v14 }
 0x558   :  { %v1024_v30 = vpop.f32.mrb[8].mxu0 }
 0x559   :  { %v1028_v31 = vadd.f32 %v1024_v30, %v2112_v55  ;;  %v1614_v32 = vpop.f32.mrb[9].mxu0  ;;  %v1433_v55 = vld [vmem:[%s2262_s6 + $0x20] sm:$0xff] }
 0x55a   :  { %v1687_v57 = vpack.c.bf16 %v1434_v56, %v1433_v55 }
 0x55b   :  { %v1031_v33 = vmul.f32 %v1028_v31, %v1028_v31 }
 0x55d   :  { %v1032_v34 = vsel %vm747_vm0, %v1031_v33, 0.0  ;;  %v1447_v33 = vld [vmem:[%s2264_s8] ss:$0 sm:$0xff] }
 0x55e   :  { %1033 = vadd.xlane.f32.xlu1 %v1032_v34 }
 0x5eb   :  { %v1034_v41 = vpop.xlane.xlu1 %1033 }
 0x5ec   :  { %v1035_v43 = vmul.f32 0.03125, %v1034_v41 }
 0x5ee   :  { %v1036_v44 = vadd.f32 1e-06, %v1035_v43 }
 0x5f0   :  { %1789 = vrsqrt.f32 %v1036_v44 }
 0x5fa   :  { %v1790_v45 = vpop.eup %1789 }
 0x5fb   :  { %v1038_v48 = vmul.f32 %v1790_v45, %v1028_v31 }
 0x5fd   :  { %v1045_v49 = vmul.f32 %v1425_v47, %v1038_v48 }
 0x5ff   :  { %1624 = vmatmul.mubr.msk.f32.vlgmr.msra.gmra.mrb[12].mxu1 %vm747_vm0, %v1045_v49 }
 0x600   :  { %1634 = vmatprep.mubr.msk.f32.mxu1 %vm1824_vm1, %v1825_v46  ;;  %1688 = vmatpush3.bf16.msra.mxu1 %v1687_v57  ;;  %v1435_v46 = vld [vmem:[%s2262_s6 + $0x30] sm:$0xff] }
 0x601   :  { %1689 = vmatprep.subr.bf16.mxu1 %v1823_v42  ;;  %v1690_v59 = vpack.c.bf16 %v1436_v58, %v1435_v46 }
 0x604   :  { %1691 = vmatpush3.bf16.msra.mxu1 %v1690_v59 }
 0x6d2   :  { %v1120_v50 = vpop.f32.mrb[12].mxu1 }
 0x6d3   :  { %v1124_v51 = vadd.f32 %v1120_v50, %v1028_v31  ;;  %v1625_v52 = vpop.f32.mrb[13].mxu1 }
 0x6d5   :  { %v1127_v53 = vmul.f32 %v1124_v51, %v1124_v51 }
 0x6d7   :  { %v1128_v54 = vsel %vm747_vm0, %v1127_v53, 0.0 }
 0x6d8   :  { %1129 = vadd.xlane.f32.xlu0 %v1128_v54 }
 0x765   :  { %v1130_v60 = vpop.xlane.xlu0 %1129 }
 0x766   :  { %v1131_v61 = vmul.f32 0.03125, %v1130_v60 }
 0x768   :  { %v1132_v62 = vadd.f32 1e-06, %v1131_v61 }
 0x76a   :  { %1791 = vrsqrt.f32 %v1132_v62 }
 0x774   :  { %v1792_v63 = vpop.eup %1791 }
 0x775   :  { %v1134_v1 = vmul.f32 %v1792_v63, %v1124_v51 }
 0x777   :  { %v1141_v2 = vmul.f32 %v1432_v0, %v1134_v1 }
 0x779   :  { %1635 = vmatmul.mubr.msk.f32.vlgmr.msra.gmra.mrb[14].mxu1 %vm747_vm0, %v1141_v2 }
 0x84c   :  { %v1216_v15 = vpop.f32.mrb[14].mxu1 }
 0x84d   :  { %1228 = vrot.lane.b32.xlu0 %v1216_v15, %s1826_s30  ;;  %v1636_v16 = vpop.f32.mrb[15].mxu1  ;;  %v1220_v17 = vsub.f32 0.0, %v1216_v15 }
 0x84f   :  { %v1221_v18 = vmul.f32 1.442695, %v1220_v17 }
 0x851   :  { %1793 = vpow2.f32 %v1221_v18 }
 0x85b   :  { %v1794_v19 = vpop.eup %1793 }
 0x85c   :  { %v1223_v20 = vadd.f32 1.0, %v1794_v19 }
 0x85e   :  { %1795 = vrcp.f32 %v1223_v20 }
 0x868   :  { %v1796_v21 = vpop.eup %1795 }
 0x869   :  { %v1226_v22 = vmul.f32 %v1796_v21, %v1216_v15 }
 0x8bf   :  { %v1229_v23 = vpop.permute.xlu0 %1228 }
 0x8c0   :  { %v1231_v24 = vmul.f32 %v1229_v23, %v1226_v22 }
 0x8c2   :  { %1654 = vmatmul.mubr.msk.f32.vlgmr.msra.gmra.mrb[10].mxu0 %vm954_vm2, %v1231_v24 }
 0x995   :  { %v1310_v25 = vpop.f32.mrb[10].mxu0 }
 0x996   :  { %v1314_v26 = vadd.f32 %v1310_v25, %v1124_v51  ;;  %v1655_v42 = vpop.f32.mrb[11].mxu0 }
 0x998   :  { %v1316_v27 = vmul.f32 %v1314_v26, %v1314_v26 }
 0x99a   :  { %v1317_v28 = vsel %vm747_vm0, %v1316_v27, 0.0 }
 0x99b   :  { %1318 = vadd.xlane.f32.xlu0 %v1317_v28 }
 0xa28   :  { %v1319_v29 = vpop.xlane.xlu0 %1318 }
 0xa29   :  { %v1320_v30 = vmul.f32 0.03125, %v1319_v29 }
 0xa2b   :  { %v1321_v31 = vadd.f32 1e-06, %v1320_v30 }
 0xa2d   :  { %1797 = vrsqrt.f32 %v1321_v31 }
 0xa37   :  { %v1798_v32 = vpop.eup %1797 }
 0xa38   :  { %v1323_v34 = vmul.f32 %v1798_v32, %v1314_v26 }
 0xa3a   :  { %v1330_v35 = vmul.f32 %v1447_v33, %v1323_v34 }
 0xa3c   :  { %1331 = vst.msk [vmem:[#allocation2] sm:$0xff] %vm747_vm0, %v1330_v35 }
 0xa3d   :  { %1810 = shalt.err (!%p1807_p4)
}
 0xa3e   :  { %s1811_s2 = scalar_lea.hbm %s2265_s9, 128 }
 0xa3f   :  { %p1812_p5 = scmp.ne.s32.totalorder %s2265_s9, %s1811_s2  ;;  %p1815_p6 = scmp.lt.u32.totalorder %s1811_s2, %s2265_s9 }
 0xa41   :  { %p1817_p7 = pnand %p1815_p6, %p1812_p5 }
 0xa43   :  { %1820 = shalt.err (!%p1817_p7)
}
 0xa44   :  { %1341 = dma.vmem_to_hbm [thread:$0]  %s1339_s4, 128, %s2265_s9, [#allocation3]  }
 0xa45   :  { %1821 = dma.done.wait [#allocation3], 128  }
 0xa46   :  { %1822 = vsyncadd [#allocation3], 4294967168 }
 0xa47   :  { %1345 = vsyncpa [#allocation3], 1 }

</bundles_post_ra>
